<compile_context>
chip_gen: v7x
topology: tpu7x:2x2x1
jax: 0.10.0
libtpu: 0.0.40
codegen_flags: <defaults>
</compile_context>

<pallas_src>
import jax
import jax.numpy as jnp
from jax.experimental import pallas as pl
from jax.experimental.pallas import tpu as pltpu

# ----- static problem configuration ----------------------------------------
B, C, H, W = 2, 8, 16, 16           # NCHW input shape
HW = H * W                          # 256 -> lane-dense (2 x 128 lanes)
C1 = C // 2                         # identity half
C2 = C - C1                         # transformed half
HID = 32                            # conditioner hidden width


# ----- Pallas kernels --------------------------------------------------------
def _coupling_fwd_kernel(x_ref, w1t_ref, b1_ref, ws_ref, bs_ref, wt_ref,
                         bt_ref, y_ref, logdet_ref):
    # x_ref: (B, 2, C1, HW) in VMEM; whole problem in one invocation.
    w1t = w1t_ref[...]                              # (HID, C1)
    b1 = b1_ref[...]                                # (HID, 1)
    ws = ws_ref[...]                                # (C2, HID)  log-scale head
    bs = bs_ref[...]                                # (C2, 1)
    wt = wt_ref[...]                                # (C2, HID)  shift head
    bt = bt_ref[...]                                # (C2, 1)

    lds = []
    for b in range(B):                              # static unroll, B = 2
        x1 = x_ref[b, 0]                            # (C1, HW) identity half
        x2 = x_ref[b, 1]                            # (C2, HW) transformed half

        # conditioner MLP: h = relu(W1^T x1 + b1); s = tanh(Ws h + bs); t = Wt h + bt
        h = jnp.maximum(
            jnp.dot(w1t, x1, preferred_element_type=jnp.float32) + b1, 0.0)
        s = jnp.tanh(
            jnp.dot(ws, h, preferred_element_type=jnp.float32) + bs)
        t = jnp.dot(wt, h, preferred_element_type=jnp.float32) + bt

        y_ref[b, 0] = x1                            # lane-dense stores
        y_ref[b, 1] = x2 * jnp.exp(s) + t
        lds.append(jnp.sum(s, keepdims=True))       # (1, 1) per-sample log|det J|

    logdet_ref[...] = jnp.concatenate(lds, axis=0)  # single (B, 1) store


def _coupling_inv_kernel(y_ref, w1t_ref, b1_ref, ws_ref, bs_ref, wt_ref,
                         bt_ref, x_ref, logdet_ref):
    w1t = w1t_ref[...]
    b1 = b1_ref[...]
    ws = ws_ref[...]
    bs = bs_ref[...]
    wt = wt_ref[...]
    bt = bt_ref[...]

    lds = []
    for b in range(B):
        y1 = y_ref[b, 0]                            # (C1, HW)
        y2 = y_ref[b, 1]                            # (C2, HW)

        h = jnp.maximum(
            jnp.dot(w1t, y1, preferred_element_type=jnp.float32) + b1, 0.0)
        s = jnp.tanh(
            jnp.dot(ws, h, preferred_element_type=jnp.float32) + bs)
        t = jnp.dot(wt, h, preferred_element_type=jnp.float32) + bt

        x_ref[b, 0] = y1
        x_ref[b, 1] = (y2 - t) * jnp.exp(-s)
        lds.append(-jnp.sum(s, keepdims=True))      # log|det J| of the inverse

    logdet_ref[...] = jnp.concatenate(lds, axis=0)


def _make_call(kernel):
    # No grid: one step; inputs + outputs + weights (~tens of KiB) fit
    # comfortably in VMEM on v5e / v6e / v7x.
    vmem = pl.BlockSpec(memory_space=pltpu.MemorySpace.VMEM)
    return pl.pallas_call(
        kernel,
        out_shape=(
            jax.ShapeDtypeStruct((B, 2, C1, HW), jnp.float32),
            jax.ShapeDtypeStruct((B, 1), jnp.float32),
        ),
        in_specs=[vmem] * 7,
        out_specs=(vmem, vmem),
    )


class AffineCouplingLayer:
    """JAX/Pallas implementation of the BaseCouplingLayer interface."""
    # TODO(synk): BaseCouplingLayer is abstract (no concrete math); this is the
    # canonical RealNVP-style affine coupling instantiation of that interface.

    def __init__(self, key):
        k1, k2, k3 = jax.random.split(key, 3)
        # weights stored pre-transposed / pre-split for the in-kernel layout
        self.w1t = (jax.random.normal(k1, (HID, C1), jnp.float32)
                    * (1.0 / jnp.sqrt(C1)))
        self.b1 = jnp.zeros((HID, 1), jnp.float32)
        self.ws = (jax.random.normal(k2, (C2, HID), jnp.float32)
                   * (1.0 / jnp.sqrt(HID)))
        self.bs = jnp.zeros((C2, 1), jnp.float32)
        self.wt = (jax.random.normal(k3, (C2, HID), jnp.float32)
                   * (1.0 / jnp.sqrt(HID)))
        self.bt = jnp.zeros((C2, 1), jnp.float32)
        self._fwd = _make_call(_coupling_fwd_kernel)
        self._inv = _make_call(_coupling_inv_kernel)

    def _params(self):
        return (self.w1t, self.b1, self.ws, self.bs, self.wt, self.bt)

    # --- single-launch primitive (y and logdet from one kernel call) --------
    def forward_and_log_det(self, x):
        y, ld = self._fwd(x.reshape(B, 2, C1, HW),   # NCHW flatten is free
                          *self._params())
        return y.reshape(B, C, H, W), ld.reshape(B)

    # --- BaseCouplingLayer interface -----------------------------------------
    def forward(self, x):
        return self.forward_and_log_det(x)[0]

    def inverse(self, y):
        x, ld = self._inv(y.reshape(B, 2, C1, HW), *self._params())
        return x.reshape(B, C, H, W), ld.reshape(B)

    def log_det_jacobian(self, x):
        return self.forward_and_log_det(x)[1]


# ----- pure-JAX reference for a correctness check ---------------------------
def _reference_forward(x, w1t, b1, ws, bs, wt, bt):
    xk = x.reshape(B, C, HW)
    x1, x2 = xk[:, :C1, :], xk[:, C1:, :]
    h = jnp.maximum(jnp.einsum("hc,bcn->bhn", w1t, x1) + b1[None], 0.0)
    s = jnp.tanh(jnp.einsum("oh,bhn->bon", ws, h) + bs[None])
    t = jnp.einsum("oh,bhn->bon", wt, h) + bt[None]
    y = jnp.concatenate([x1, x2 * jnp.exp(s) + t], axis=1)
    return y.reshape(B, C, H, W), jnp.sum(s, axis=(1, 2))


if __name__ == "__main__":
    key = jax.random.PRNGKey(0)
    kx, kp = jax.random.split(key)
    x = jax.random.normal(kx, (B, C, H, W), jnp.float32)

    layer = AffineCouplingLayer(kp)

    # one kernel launch gives both y and log|det J|
    y, logdet = layer.forward_and_log_det(x)
    x_rec, inv_logdet = layer.inverse(y)

    jax.block_until_ready((y, logdet, x_rec, inv_logdet))

    # correctness checks against pure-JAX reference + round-trip
    y_ref, ld_ref = _reference_forward(x, *layer._params())
    assert jnp.allclose(y, y_ref, atol=1e-4, rtol=1e-4)
    assert jnp.allclose(logdet, ld_ref, atol=1e-3, rtol=1e-3)
    assert jnp.allclose(x_rec, x, atol=1e-4, rtol=1e-4)
    assert jnp.allclose(inv_logdet, -logdet, atol=1e-3, rtol=1e-3)

    print("KERNEL_OK")
</pallas_src>

<mosaic_0001>
module attributes {stable_mosaic.version = 11 : i64} {
  func.func @_coupling_fwd_kernel(%arg0: memref<2x2x4x256xf32, #tpu.memory_space<vmem>>, %arg1: memref<32x4xf32, #tpu.memory_space<vmem>>, %arg2: memref<32x1xf32, #tpu.memory_space<vmem>>, %arg3: memref<4x32xf32, #tpu.memory_space<vmem>>, %arg4: memref<4x1xf32, #tpu.memory_space<vmem>>, %arg5: memref<4x32xf32, #tpu.memory_space<vmem>>, %arg6: memref<4x1xf32, #tpu.memory_space<vmem>>, %arg7: memref<2x2x4x256xf32, #tpu.memory_space<vmem>>, %arg8: memref<2x1xf32, #tpu.memory_space<vmem>>) attributes {dimension_semantics = [], scalar_prefetch = 0 : i64, scratch_operands = 0 : i64, tpu.core_type = #tpu.core_type<tc>} {
    %c0 = arith.constant 0 : index
    %c0_0 = arith.constant 0 : index
    %0 = vector.load %arg1[%c0, %c0_0] : memref<32x4xf32, #tpu.memory_space<vmem>>, vector<32x4xf32>
    %c0_1 = arith.constant 0 : index
    %c0_2 = arith.constant 0 : index
    %1 = vector.load %arg2[%c0_1, %c0_2] : memref<32x1xf32, #tpu.memory_space<vmem>>, vector<32x1xf32>
    %c0_3 = arith.constant 0 : index
    %c0_4 = arith.constant 0 : index
    %2 = vector.load %arg3[%c0_3, %c0_4] : memref<4x32xf32, #tpu.memory_space<vmem>>, vector<4x32xf32>
    %c0_5 = arith.constant 0 : index
    %c0_6 = arith.constant 0 : index
    %3 = vector.load %arg4[%c0_5, %c0_6] : memref<4x1xf32, #tpu.memory_space<vmem>>, vector<4x1xf32>
    %c0_7 = arith.constant 0 : index
    %c0_8 = arith.constant 0 : index
    %4 = vector.load %arg5[%c0_7, %c0_8] : memref<4x32xf32, #tpu.memory_space<vmem>>, vector<4x32xf32>
    %c0_9 = arith.constant 0 : index
    %c0_10 = arith.constant 0 : index
    %5 = vector.load %arg6[%c0_9, %c0_10] : memref<4x1xf32, #tpu.memory_space<vmem>>, vector<4x1xf32>
    %c0_11 = arith.constant 0 : index
    %c0_12 = arith.constant 0 : index
    %c0_13 = arith.constant 0 : index
    %c0_14 = arith.constant 0 : index
    %6 = vector.load %arg0[%c0_11, %c0_12, %c0_13, %c0_14] : memref<2x2x4x256xf32, #tpu.memory_space<vmem>>, vector<1x1x4x256xf32>
    %7 = vector.shape_cast %6 : vector<1x1x4x256xf32> to vector<4x256xf32>
    %c0_15 = arith.constant 0 : index
    %c1 = arith.constant 1 : index
    %c0_16 = arith.constant 0 : index
    %c0_17 = arith.constant 0 : index
    %8 = vector.load %arg0[%c0_15, %c1, %c0_16, %c0_17] : memref<2x2x4x256xf32, #tpu.memory_space<vmem>>, vector<1x1x4x256xf32>
    %9 = vector.shape_cast %8 : vector<1x1x4x256xf32> to vector<4x256xf32>
    %cst = arith.constant dense<0.000000e+00> : vector<32x256xf32>
    %10 = tpu.matmul %0, %7, %cst {dimension_numbers = #tpu.dot_dimension_numbers<[1], [0], [0], [1], [0, 0, 1, 1], [], []>} : vector<32x4xf32>, vector<4x256xf32>, vector<32x256xf32> -> vector<32x256xf32>
    %11 = vector.broadcast %1 : vector<32x1xf32> to vector<32x256xf32>
    %12 = arith.addf %10, %11 : vector<32x256xf32>
    %cst_18 = arith.constant 0.000000e+00 : f32
    %13 = vector.broadcast %cst_18 : f32 to vector<32x256xf32>
    %14 = arith.maximumf %12, %13 : vector<32x256xf32>
    %cst_19 = arith.constant dense<0.000000e+00> : vector<4x256xf32>
    %15 = tpu.matmul %2, %14, %cst_19 {dimension_numbers = #tpu.dot_dimension_numbers<[1], [0], [0], [1], [0, 0, 1, 1], [], []>} : vector<4x32xf32>, vector<32x256xf32>, vector<4x256xf32> -> vector<4x256xf32>
    %16 = vector.broadcast %3 : vector<4x1xf32> to vector<4x256xf32>
    %17 = arith.addf %15, %16 : vector<4x256xf32>
    %18 = math.tanh %17 : vector<4x256xf32>
    %cst_20 = arith.constant dense<0.000000e+00> : vector<4x256xf32>
    %19 = tpu.matmul %4, %14, %cst_20 {dimension_numbers = #tpu.dot_dimension_numbers<[1], [0], [0], [1], [0, 0, 1, 1], [], []>} : vector<4x32xf32>, vector<32x256xf32>, vector<4x256xf32> -> vector<4x256xf32>
    %20 = vector.broadcast %5 : vector<4x1xf32> to vector<4x256xf32>
    %21 = arith.addf %19, %20 : vector<4x256xf32>
    %c0_21 = arith.constant 0 : index
    %c0_22 = arith.constant 0 : index
    %c0_23 = arith.constant 0 : index
    %c0_24 = arith.constant 0 : index
    %22 = vector.load %arg7[%c0_21, %c0_22, %c0_23, %c0_24] : memref<2x2x4x256xf32, #tpu.memory_space<vmem>>, vector<1x1x4x256xf32>
    %23 = vector.shape_cast %22 : vector<1x1x4x256xf32> to vector<4x256xf32>
    %24 = vector.shape_cast %7 : vector<4x256xf32> to vector<1x1x4x256xf32>
    tpu.vector_store %arg7[%c0_21, %c0_22, %c0_23, %c0_24], %24 {strides = array<i32>} : memref<2x2x4x256xf32, #tpu.memory_space<vmem>>, vector<1x1x4x256xf32>,
    %25 = math.exp %18 : vector<4x256xf32>
    %26 = arith.mulf %9, %25 : vector<4x256xf32>
    %27 = arith.addf %26, %21 : vector<4x256xf32>
    %c0_25 = arith.constant 0 : index
    %c1_26 = arith.constant 1 : index
    %c0_27 = arith.constant 0 : index
    %c0_28 = arith.constant 0 : index
    %28 = vector.load %arg7[%c0_25, %c1_26, %c0_27, %c0_28] : memref<2x2x4x256xf32, #tpu.memory_space<vmem>>, vector<1x1x4x256xf32>
    %29 = vector.shape_cast %28 : vector<1x1x4x256xf32> to vector<4x256xf32>
    %30 = vector.shape_cast %27 : vector<4x256xf32> to vector<1x1x4x256xf32>
    tpu.vector_store %arg7[%c0_25, %c1_26, %c0_27, %c0_28], %30 {strides = array<i32>} : memref<2x2x4x256xf32, #tpu.memory_space<vmem>>, vector<1x1x4x256xf32>,
    %31 = vector.shape_cast %18 : vector<4x256xf32> to vector<1x4x256xf32>
    %cst_29 = arith.constant dense<0.000000e+00> : vector<1xf32>
    %32 = vector.multi_reduction <add>, %31, %cst_29 [1, 2] : vector<1x4x256xf32> to vector<1xf32>
    %33 = vector.shape_cast %32 : vector<1xf32> to vector<1x1x1xf32>
    %34 = vector.extract %33[0, 0, 0] : f32 from vector<1x1x1xf32>
    %35 = vector.broadcast %34 : f32 to vector<1x1xf32>
    %c1_30 = arith.constant 1 : index
    %c0_31 = arith.constant 0 : index
    %c0_32 = arith.constant 0 : index
    %c0_33 = arith.constant 0 : index
    %36 = vector.load %arg0[%c1_30, %c0_31, %c0_32, %c0_33] : memref<2x2x4x256xf32, #tpu.memory_space<vmem>>, vector<1x1x4x256xf32>
    %37 = vector.shape_cast %36 : vector<1x1x4x256xf32> to vector<4x256xf32>
    %c1_34 = arith.constant 1 : index
    %c1_35 = arith.constant 1 : index
    %c0_36 = arith.constant 0 : index
    %c0_37 = arith.constant 0 : index
    %38 = vector.load %arg0[%c1_34, %c1_35, %c0_36, %c0_37] : memref<2x2x4x256xf32, #tpu.memory_space<vmem>>, vector<1x1x4x256xf32>
    %39 = vector.shape_cast %38 : vector<1x1x4x256xf32> to vector<4x256xf32>
    %cst_38 = arith.constant dense<0.000000e+00> : vector<32x256xf32>
    %40 = tpu.matmul %0, %37, %cst_38 {dimension_numbers = #tpu.dot_dimension_numbers<[1], [0], [0], [1], [0, 0, 1, 1], [], []>} : vector<32x4xf32>, vector<4x256xf32>, vector<32x256xf32> -> vector<32x256xf32>
    %41 = vector.broadcast %1 : vector<32x1xf32> to vector<32x256xf32>
    %42 = arith.addf %40, %41 : vector<32x256xf32>
    %cst_39 = arith.constant 0.000000e+00 : f32
    %43 = vector.broadcast %cst_39 : f32 to vector<32x256xf32>
    %44 = arith.maximumf %42, %43 : vector<32x256xf32>
    %cst_40 = arith.constant dense<0.000000e+00> : vector<4x256xf32>
    %45 = tpu.matmul %2, %44, %cst_40 {dimension_numbers = #tpu.dot_dimension_numbers<[1], [0], [0], [1], [0, 0, 1, 1], [], []>} : vector<4x32xf32>, vector<32x256xf32>, vector<4x256xf32> -> vector<4x256xf32>
    %46 = vector.broadcast %3 : vector<4x1xf32> to vector<4x256xf32>
    %47 = arith.addf %45, %46 : vector<4x256xf32>
    %48 = math.tanh %47 : vector<4x256xf32>
    %cst_41 = arith.constant dense<0.000000e+00> : vector<4x256xf32>
    %49 = tpu.matmul %4, %44, %cst_41 {dimension_numbers = #tpu.dot_dimension_numbers<[1], [0], [0], [1], [0, 0, 1, 1], [], []>} : vector<4x32xf32>, vector<32x256xf32>, vector<4x256xf32> -> vector<4x256xf32>
    %50 = vector.broadcast %5 : vector<4x1xf32> to vector<4x256xf32>
    %51 = arith.addf %49, %50 : vector<4x256xf32>
    %c1_42 = arith.constant 1 : index
    %c0_43 = arith.constant 0 : index
    %c0_44 = arith.constant 0 : index
    %c0_45 = arith.constant 0 : index
    %52 = vector.load %arg7[%c1_42, %c0_43, %c0_44, %c0_45] : memref<2x2x4x256xf32, #tpu.memory_space<vmem>>, vector<1x1x4x256xf32>
    %53 = vector.shape_cast %52 : vector<1x1x4x256xf32> to vector<4x256xf32>
    %54 = vector.shape_cast %37 : vector<4x256xf32> to vector<1x1x4x256xf32>
    tpu.vector_store %arg7[%c1_42, %c0_43, %c0_44, %c0_45], %54 {strides = array<i32>} : memref<2x2x4x256xf32, #tpu.memory_space<vmem>>, vector<1x1x4x256xf32>,
    %55 = math.exp %48 : vector<4x256xf32>
    %56 = arith.mulf %39, %55 : vector<4x256xf32>
    %57 = arith.addf %56, %51 : vector<4x256xf32>
    %c1_46 = arith.constant 1 : index
    %c1_47 = arith.constant 1 : index
    %c0_48 = arith.constant 0 : index
    %c0_49 = arith.constant 0 : index
    %58 = vector.load %arg7[%c1_46, %c1_47, %c0_48, %c0_49] : memref<2x2x4x256xf32, #tpu.memory_space<vmem>>, vector<1x1x4x256xf32>
    %59 = vector.shape_cast %58 : vector<1x1x4x256xf32> to vector<4x256xf32>
    %60 = vector.shape_cast %57 : vector<4x256xf32> to vector<1x1x4x256xf32>
    tpu.vector_store %arg7[%c1_46, %c1_47, %c0_48, %c0_49], %60 {strides = array<i32>} : memref<2x2x4x256xf32, #tpu.memory_space<vmem>>, vector<1x1x4x256xf32>,
    %61 = vector.shape_cast %48 : vector<4x256xf32> to vector<1x4x256xf32>
    %cst_50 = arith.constant dense<0.000000e+00> : vector<1xf32>
    %62 = vector.multi_reduction <add>, %61, %cst_50 [1, 2] : vector<1x4x256xf32> to vector<1xf32>
    %63 = vector.shape_cast %62 : vector<1xf32> to vector<1x1x1xf32>
    %64 = vector.extract %63[0, 0, 0] : f32 from vector<1x1x1xf32>
    %65 = vector.broadcast %64 : f32 to vector<1x1xf32>
    %66 = tpu.concatenate %35, %65 in 0 : vector<1x1xf32>, vector<1x1xf32> -> vector<2x1xf32>
    %c0_51 = arith.constant 0 : index
    %c0_52 = arith.constant 0 : index
    %67 = vector.load %arg8[%c0_51, %c0_52] : memref<2x1xf32, #tpu.memory_space<vmem>>, vector<2x1xf32>
    tpu.vector_store %arg8[%c0_51, %c0_52], %66 {strides = array<i32>} : memref<2x1xf32, #tpu.memory_space<vmem>>, vector<2x1xf32>,
    return
  }
}

</mosaic_0001>

<bundles_post_ra>
// kernel: tpu_custom_call.1
= control target key start
LH: loop header
LB: loop body
LE: loop exit
PB: predicated region body
PF: predicated region fallthrough
CT: control target
= control target key end

     0   :  { %vm79_vm0 = vcmask 1043456   ;;  %v782_v3 = vmov 0.0   ;;  %vm66_vm1 = vcmask 31744   ;;  %v783_v6 = vmov 0   ;;  %s927_s0 = inlined_call_operand.vmem [shape: f32[2,2,4,256], index: 0, kind: input, shape index: {}]   ;;  %s928_s1 = inlined_call_operand.vmem [shape: f32[32,4], index: 1, kind: input, shape index: {}]   ;;  %s929_s2 = inlined_call_operand.vmem [shape: f32[32,1], index: 2, kind: input, shape index: {}]   ;;  %s930_s3 = inlined_call_operand.vmem [shape: f32[4,32], index: 3, kind: input, shape index: {}]   ;;  %s931_s4 = inlined_call_operand.vmem [shape: f32[4,1], index: 4, kind: input, shape index: {}]   ;;  %s932_s5 = inlined_call_operand.vmem [shape: f32[4,32], index: 5, kind: input, shape index: {}]   ;;  %s933_s6 = inlined_call_operand.vmem [shape: f32[4,1], index: 6, kind: input, shape index: {}]   ;;  %s934_s7 = inlined_call_operand.hbm [shape: f32[2,2,4,256], index: 7, kind: output, shape index: {0}]   ;;  %s935_s8 = inlined_call_operand.vmem [shape: f32[2,1], index: 8, kind: output, shape index: {1}]  }
   0x1   :  { %v41_v0 = vld [vmem:[%s927_s0] sm:$0xff]  ;;  %v687_v1 = vld [vmem:[%s927_s0 + $0x10] sm:$0xff]  ;;  %148 = vmatprep.mubr.f32.mxu0 %v782_v3  ;;  %254 = vmatprep.mubr.f32.mxu1 %v782_v3 }
   0x2   :  { %v65_v2 = vcombine.high %v41_v0, %v41_v0  ;;  %342 = vst [vmem:[#allocation2] sm:$0xff] %v41_v0  ;;  %v377_v4 = vcombine.high %v687_v1, %v687_v1  ;;  %624 = vst [vmem:[#allocation2 + $0x10] sm:$0xff] %v687_v1  ;;  %v29_v5 = vld [vmem:[%s928_s1] sm:$0xff]  ;;  %738 = vset.pattern.permute.xlu0 %v783_v6  ;;  %739 = vset.pattern.permute.xlu1 %v783_v6  ;;  %v35_v8 = vld [vmem:[%s929_s2 + $0x10] sm:$0xff] }
   0x3   :  { %v33_v7 = vld [vmem:[%s929_s2] sm:$0xff] }
   0x4   :  { %679 = vmatprep.subr.msk.mxu0 %vm79_vm0, %v65_v2  ;;  %46 = vperm.xlu0 %738, %v33_v7  }
   0x5   :  { %14 = vsyncpa [#allocation3], 0  ;;  %680 = vmatpush1.msk.msra.mxu0 %vm79_vm0, %v41_v0  ;;  %v34_v9 = vld [vmem:[%s929_s2 + $0x8] sm:$0xff]  ;;  %56 = vperm.xlu1 %739, %v35_v8   ;;  %v36_v10 = vld [vmem:[%s929_s2 + $0x18] sm:$0xff]  ;;  %vm186_vm2 = vcmask 261120   ;;  %s784_s9 = smov [#allocation2]  }
   0x6   :  { %681 = vmatmul.mubr.msk.f32.vlgmr.msra.gmra.mrb[0].mxu0 %vm66_vm1, %v29_v5  ;;  %689 = vmatprep.subr.msk.mxu0 %vm79_vm0, %v377_v4  ;;  %v30_v11 = vld [vmem:[%s928_s1 + $0x8] sm:$0xff]  ;;  %v38_v12 = vld [vmem:[%s931_s4] sm:$0xf]  ;;  %v31_v13 = vld [vmem:[%s928_s1 + $0x10] sm:$0xff]  ;;  %s663_s10 = sshll.u32 %s784_s9, 4  ;;  %s664_s10 = int_to_ptr.vmem [resolvable:$true] %s663_s10 }
   0x7   :  { %690 = vmatpush1.msk.msra.mxu0 %vm79_vm0, %v687_v1  ;;  %154 = vmatprep.mubr.f32.mxu0 %v782_v3  ;;  %v32_v14 = vld [vmem:[%s928_s1 + $0x18] sm:$0xff]  ;;  %v37_v54 = vld [vmem:[%s930_s3] sm:$0xf]  ;;  %p763_p1 = scmp.lt.s32.totalorder %s664_s10, %s664_s10 }
   0x8   :  { %51 = vperm.xlu0 %738, %v34_v9   ;;  %v39_v6 = vld [vmem:[%s932_s5] sm:$0xf] }
   0x9   :  { %61 = vperm.xlu1 %739, %v36_v10  }
   0xa   :  { %682 = vmatmul.mubr.msk.f32.gmra.mrb[2].mxu0 %vm66_vm1, %v30_v11 }
   0xb   :  { %160 = vmatprep.mubr.f32.mxu0 %v782_v3 }
   0xc   :  { %183 = vperm.xlu0 %738, %v38_v12  }
   0xe   :  { %683 = vmatmul.mubr.msk.f32.gmra.mrb[4].mxu0 %vm66_vm1, %v31_v13 }
   0xf   :  { %166 = vmatprep.mubr.f32.mxu0 %v782_v3 }
  0x12   :  { %684 = vmatmul.mubr.msk.f32.gmra.mrb[6].mxu0 %vm66_vm1, %v32_v14 }
  0x13   :  { %446 = vmatprep.mubr.f32.mxu0 %v782_v3 }
  0x16   :  { %691 = vmatmul.mubr.msk.f32.vlgmr.msra.gmra.mrb[8].mxu0 %vm66_vm1, %v29_v5 }
  0x17   :  { %452 = vmatprep.mubr.f32.mxu0 %v782_v3 }
  0x1a   :  { %692 = vmatmul.mubr.msk.f32.gmra.mrb[10].mxu0 %vm66_vm1, %v30_v11 }
  0x1b   :  { %458 = vmatprep.mubr.f32.mxu0 %v782_v3 }
  0x1e   :  { %693 = vmatmul.mubr.msk.f32.gmra.mrb[12].mxu0 %vm66_vm1, %v31_v13 }
  0x1f   :  { %464 = vmatprep.mubr.f32.mxu0 %v782_v3 }
  0x22   :  { %694 = vmatmul.mubr.msk.f32.gmra.mrb[14].mxu0 %vm66_vm1, %v32_v14 }
  0x83   :  { %v47_v15 = vpop.permute.xlu0 %46 }
  0x84   :  { %v57_v25 = vpop.permute.xlu1 %56 }
  0x87   :  { %v52_v20 = vpop.permute.xlu0 %51 }
  0x88   :  { %v62_v36 = vpop.permute.xlu1 %61 }
  0x8b   :  { %v184_v14 = vpop.permute.xlu0 %183 }
  0xd9   :  { %v150_v16 = vpop.f32.mrb[0].mxu0 }
  0xda   :  { %v152_v17 = vpop.f32.mrb[1].mxu0  ;;  %v151_v18 = vadd.f32 %v150_v16, %v47_v15 }
  0xdb   :  { %v153_v19 = vadd.f32 %v152_v17, %v47_v15 }
  0xdc   :  { %v173_v26 = vmax.f32 %v151_v18, 0.0 }
  0xdd   :  { %v156_v21 = vpop.f32.mrb[2].mxu0  ;;  %v174_v28 = vmax.f32 %v153_v19, 0.0 }
  0xde   :  { %v157_v22 = vadd.f32 %v156_v21, %v52_v20  ;;  %v158_v23 = vpop.f32.mrb[3].mxu0 }
  0xdf   :  { %v159_v24 = vadd.f32 %v158_v23, %v52_v20 }
  0xe0   :  { %v175_v27 = vmax.f32 %v157_v22, 0.0 }
  0xe1   :  { %v176_v29 = vmax.f32 %v159_v24, 0.0  ;;  %v162_v30 = vpop.f32.mrb[4].mxu0 }
  0xe2   :  { %v164_v31 = vpop.f32.mrb[5].mxu0  ;;  %v699_v32 = vpack.c.bf16 %v175_v27, %v173_v26  ;;  %v163_v34 = vadd.f32 %v162_v30, %v57_v25 }
  0xe3   :  { %v697_v33 = vpack.c.bf16 %v176_v29, %v174_v28  ;;  %v165_v35 = vadd.f32 %v164_v31, %v57_v25 }
  0xe4   :  { %v177_v41 = vmax.f32 %v163_v34, 0.0 }
  0xe5   :  { %v168_v37 = vpop.f32.mrb[6].mxu0  ;;  %698 = vmatprep.subr.bf16.mxu1 %v697_v33  ;;  %v178_v43 = vmax.f32 %v165_v35, 0.0 }
  0xe6   :  { %v169_v38 = vadd.f32 %v168_v37, %v62_v36  ;;  %v170_v39 = vpop.f32.mrb[7].mxu0  ;;  %700 = vmatpush1.bf16.msra.mxu1 %v699_v32 }
  0xe7   :  { %v171_v40 = vadd.f32 %v170_v39, %v62_v36 }
  0xe8   :  { %v179_v42 = vmax.f32 %v169_v38, 0.0 }
  0xe9   :  { %v180_v44 = vmax.f32 %v171_v40, 0.0  ;;  %v448_v45 = vpop.f32.mrb[8].mxu0 }
  0xea   :  { %v703_v46 = vpack.c.bf16 %v179_v42, %v177_v41  ;;  %v450_v47 = vpop.f32.mrb[9].mxu0  ;;  %v449_v49 = vadd.f32 %v448_v45, %v47_v15  ;;  %v40_v45 = vld [vmem:[%s933_s6] sm:$0xf] }
  0xeb   :  { %v701_v48 = vpack.c.bf16 %v180_v44, %v178_v43  ;;  %v451_v50 = vadd.f32 %v450_v47, %v47_v15 }
  0xec   :  { %v471_v56 = vmax.f32 %v449_v49, 0.0 }
  0xed   :  { %702 = vmatprep.subr.bf16.mxu1 %v701_v48  ;;  %v454_v51 = vpop.f32.mrb[10].mxu0  ;;  %v472_v58 = vmax.f32 %v451_v50, 0.0 }
  0xee   :  { %v455_v52 = vadd.f32 %v454_v51, %v52_v20  ;;  %704 = vmatpush1.bf16.msra.mxu1 %v703_v46  ;;  %v456_v53 = vpop.f32.mrb[11].mxu0 }
  0xef   :  { %v457_v55 = vadd.f32 %v456_v53, %v52_v20  ;;  %706 = vmatprep.subr.bf16.mxu1 %v697_v33 }
  0xf0   :  { %v473_v57 = vmax.f32 %v455_v52, 0.0 }
  0xf1   :  { %v474_v59 = vmax.f32 %v457_v55, 0.0  ;;  %685 = vmatmul.mubr.msk.f32.vlgmr.msra.gmra.mrb[0].mxu1 %vm186_vm2, %v37_v54  ;;  %v460_v60 = vpop.f32.mrb[12].mxu0 }
  0xf2   :  { %v715_v61 = vpack.c.bf16 %v473_v57, %v471_v56  ;;  %708 = vmatpush1.bf16.msra.mxu1 %v699_v32  ;;  %v462_v62 = vpop.f32.mrb[13].mxu0  ;;  %335 = vmatprep.mubr.f32.mxu1 %v782_v3  ;;  %v461_v0 = vadd.f32 %v460_v60, %v57_v25  ;;  %v688_v60 = vld [vmem:[%s927_s0 + $0x18] sm:$0xff] }
  0xf3   :  { %v713_v63 = vpack.c.bf16 %v474_v59, %v472_v58  ;;  %710 = vmatprep.subr.bf16.mxu1 %v701_v48  ;;  %v463_v1 = vadd.f32 %v462_v62, %v57_v25  ;;  %v678_v59 = vld [vmem:[%s927_s0 + $0x8] sm:$0xff]  ;;  %s758_s0 = scalar_lea.vmem %s664_s10, 512 }
  0xf4   :  { %v475_v8 = vmax.f32 %v461_v0, 0.0  ;;  %p759_p0 = scmp.ne.s32.totalorder %s664_s10, %s758_s0  ;;  %p764_p2 = scmp.lt.s32.totalorder %s758_s0, %s758_s0 }
  0xf5   :  { %v466_v2 = vpop.f32.mrb[14].mxu0  ;;  %v476_v10 = vmax.f32 %v463_v1, 0.0 }
  0xf6   :  { %v467_v4 = vadd.f32 %v466_v2, %v62_v36  ;;  %712 = vmatpush1.bf16.msra.mxu1 %v703_v46  ;;  %v468_v5 = vpop.f32.mrb[15].mxu0  ;;  %p765_p3 = por %p764_p2, %p763_p1 }
  0xf7   :  { %v469_v7 = vadd.f32 %v468_v5, %v62_v36  ;;  %714 = vmatprep.subr.bf16.mxu1 %v713_v63 }
  0xf8   :  { %v477_v9 = vmax.f32 %v467_v4, 0.0  ;;  %p766_p4 = pnand %p765_p3, %p759_p0 }
  0xf9   :  { %v478_v11 = vmax.f32 %v469_v7, 0.0  ;;  %686 = vmatmul.mubr.msk.f32.vlgmr.msra.gmra.mrb[2].mxu1 %vm186_vm2, %v39_v6 }
  0xfa   :  { %v719_v12 = vpack.c.bf16 %v477_v9, %v475_v8  ;;  %716 = vmatpush1.bf16.msra.mxu1 %v715_v61  ;;  %543 = vmatprep.mubr.f32.mxu1 %v782_v3 }
  0xfb   :  { %v717_v13 = vpack.c.bf16 %v478_v11, %v476_v10 }
  0xfd   :  { %718 = vmatprep.subr.bf16.mxu1 %v717_v13 }
  0xfe   :  { %720 = vmatpush1.bf16.msra.mxu1 %v719_v12 }
  0xff   :  { %722 = vmatprep.subr.bf16.mxu1 %v713_v63 }
 0x101   :  { %695 = vmatmul.mubr.msk.f32.vlgmr.msra.gmra.mrb[4].mxu1 %vm186_vm2, %v37_v54 }
 0x102   :  { %724 = vmatpush1.bf16.msra.mxu1 %v715_v61  ;;  %616 = vmatprep.mubr.f32.mxu1 %v782_v3 }
 0x103   :  { %726 = vmatprep.subr.bf16.mxu1 %v717_v13 }
 0x106   :  { %728 = vmatpush1.bf16.msra.mxu1 %v719_v12 }
 0x109   :  { %696 = vmatmul.mubr.msk.f32.vlgmr.msra.gmra.mrb[6].mxu1 %vm186_vm2, %v39_v6 }
 0x1c4   :  { %v256_v15 = vpop.f32.mrb[0].mxu1 }
 0x1c5   :  { %v257_v16 = vadd.f32 %v256_v15, %v184_v14  ;;  %v258_v17 = vpop.f32.mrb[1].mxu1 }
 0x1c6   :  { %v259_v18 = vadd.f32 %v258_v17, %v184_v14 }
 0x1c7   :  { %742 = vtanh.f32 %v257_v16 }
 0x1c8   :  { %744 = vtanh.f32 %v259_v18 }
 0x1cc   :  { %v337_v19 = vpop.f32.mrb[2].mxu1 }
 0x1cd   :  { %v339_v20 = vpop.f32.mrb[3].mxu1 }
 0x1d1   :  { %v743_v21 = vpop.eup %742 }
 0x1d2   :  { %v745_v22 = vpop.eup %744  ;;  %v343_v23 = vmul.f32 1.442695, %v743_v21  ;;  %v359_v24 = vsel %vm79_vm0, %v743_v21, 0.0 }
 0x1d3   :  { %v345_v25 = vmul.f32 1.442695, %v745_v22  ;;  %v360_v3 = vsel %vm79_vm0, %v745_v22, 0.0 }
 0x1d4   :  { %746 = vpow2.f32 %v343_v23  ;;  %v545_v26 = vpop.f32.mrb[4].mxu1  ;;  %v361_v27 = vadd.f32 %v360_v3, %v359_v24 }
 0x1d5   :  { %748 = vpow2.f32 %v345_v25  ;;  %v546_v28 = vadd.f32 %v545_v26, %v184_v14  ;;  %v547_v29 = vpop.f32.mrb[5].mxu1 }
 0x1d6   :  { %v548_v30 = vadd.f32 %v547_v29, %v184_v14  ;;  %362 = vadd.xlane.f32.xlu1 %v361_v27 }
 0x1d7   :  { %750 = vtanh.f32 %v546_v28 }
 0x1d8   :  { %752 = vtanh.f32 %v548_v30 }
 0x1dc   :  { %v618_v44 = vpop.f32.mrb[6].mxu1 }
 0x1dd   :  { %v620_v46 = vpop.f32.mrb[7].mxu1 }
 0x1de   :  { %v747_v31 = vpop.eup %746 }
 0x1df   :  { %v749_v32 = vpop.eup %748 }
 0x1e0   :  { %v349_v33 = vcombine.low %v747_v31, %v749_v32 }
 0x1e1   :  { %v751_v34 = vpop.eup %750 }
 0x1e2   :  { %v753_v35 = vpop.eup %752  ;;  %v625_v36 = vmul.f32 1.442695, %v751_v34  ;;  %v641_v37 = vsel %vm79_vm0, %v751_v34, 0.0  ;;  %v351_v4 = vmul.f32 %v678_v59, %v349_v33 }
 0x1e3   :  { %v627_v38 = vmul.f32 1.442695, %v753_v35  ;;  %v642_v39 = vsel %vm79_vm0, %v753_v35, 0.0 }
 0x1e4   :  { %754 = vpow2.f32 %v625_v36  ;;  %v643_v40 = vadd.f32 %v642_v39, %v641_v37 }
 0x1e5   :  { %756 = vpow2.f32 %v627_v38 }
 0x1e6   :  { %644 = vadd.xlane.f32.xlu0 %v643_v40 }
 0x1ee   :  { %v755_v41 = vpop.eup %754 }
 0x1ef   :  { %v757_v42 = vpop.eup %756 }
 0x1f0   :  { %v631_v43 = vcombine.low %v755_v41, %v757_v42 }
 0x1f2   :  { %v633_v6 = vmul.f32 %v688_v60, %v631_v43 }
 0x1fc   :  { %265 = vperm.xlu0 %738, %v40_v45  }
 0x263   :  { %v363_v47 = vpop.xlane.xlu1 %362 }
 0x264   :  { %v364_v48 = vrot.slane %v363_v47, 4 }
 0x266   :  { %v365_v49 = vadd.f32 %v364_v48, %v363_v47 }
 0x268   :  { %v366_v50 = vrot.slane %v365_v49, 2 }
 0x26a   :  { %v367_v51 = vadd.f32 %v366_v50, %v365_v49 }
 0x26c   :  { %v368_v52 = vrot.slane %v367_v51, 1 }
 0x26e   :  { %v369_v53 = vadd.f32 %v368_v52, %v367_v51 }
 0x270   :  { %729 = vpush %v369_v53 }
 0x273   :  { %v645_v54 = vpop.xlane.xlu0 %644 }
 0x274   :  { %v646_v55 = vrot.slane %v645_v54, 4 }
 0x276   :  { %v647_v56 = vadd.f32 %v646_v55, %v645_v54 }
 0x278   :  { %v648_v57 = vrot.slane %v647_v56, 2 }
 0x27a   :  { %v649_v58 = vadd.f32 %v648_v57, %v647_v56 }
 0x27b   :  { %v266_v61 = vpop.permute.xlu0 %265 }
 0x27c   :  { %v338_v62 = vadd.f32 %v337_v19, %v266_v61  ;;  %v340_v63 = vadd.f32 %v339_v20, %v266_v61  ;;  %v619_v0 = vadd.f32 %v618_v44, %v266_v61  ;;  %v621_v1 = vadd.f32 %v620_v46, %v266_v61 }
 0x27d   :  { %v650_v2 = vrot.slane %v649_v58, 1 }
 0x27e   :  { %v354_v5 = vcombine.low %v338_v62, %v340_v63  ;;  %v636_v7 = vcombine.low %v619_v0, %v621_v1 }
 0x27f   :  { %v651_v8 = vadd.f32 %v650_v2, %v649_v58 }
 0x280   :  { %v356_v9 = vadd.f32 %v354_v5, %v351_v4  ;;  %v638_v10 = vadd.f32 %v636_v7, %v633_v6 }
 0x281   :  { %731 = vpush %v651_v8 }
 0x282   :  { %358 = vst [vmem:[#allocation2 + $0x8] sm:$0xff] %v356_v9  ;;  %640 = vst [vmem:[#allocation2 + $0x18] sm:$0xff] %v638_v10 }
 0x283   :  { %769 = shalt.err (!%p766_p4)
}
 0x284   :  { %s770_s13 = scalar_lea.hbm %s934_s7, 512 }
 0x285   :  { %p771_p5 = scmp.ne.s32.totalorder %s934_s7, %s770_s13  ;;  %p774_p6 = scmp.lt.u32.totalorder %s770_s13, %s934_s7 }
 0x287   :  { %p776_p7 = pnand %p774_p6, %p771_p5 }
 0x289   :  { %779 = shalt.err (!%p776_p7)
}
 0x28a   :  { %s785_s18 = smov 128   ;;  %s786_s19 = smov 8   ;;  %vm654_vm3 = vcmask 1040384   ;;  %vm656_vm4 = vcmask 1024  }
 0x28b   :  { %669 = dma.vmem_to_hbm [thread:$0]  %s664_s10, 512, %s934_s7, [#allocation3], %s785_s18, %s785_s18, %s786_s19  }
 0x2a1   :  { %s730_s22 = spop %729 }
 0x2a2   :  { %v371_v11 = vstv %s730_s22 }
 0x2b2   :  { %s732_s23 = spop %731 }
 0x2b3   :  { %v653_v12 = vstv %s732_s23 }
 0x2b4   :  { %v655_v13 = vsel %vm654_vm3, %v371_v11, %v653_v12 }
 0x2b5   :  { %657 = vst.msk [vmem:[%s935_s8] sm:$0x3] %vm656_vm4, %v655_v13 }
 0x2b6   :  { %780 = dma.done.wait [#allocation3], 512  }
 0x2b7   :  { %781 = vsyncadd [#allocation3], 4294966784 }
 0x2b8   :  { %677 = vsyncpa [#allocation3], 1 }

</bundles_post_ra>
